<compile_context>
chip_gen: v7x
topology: tpu7x:2x2x1
jax: 0.10.0
libtpu: 0.0.40
codegen_flags: <defaults>
</compile_context>

<pallas_src>
import functools

import jax
import jax.numpy as jnp
from jax.experimental import pallas as pl
from jax.experimental.pallas import tpu as pltpu


def _gru_kernel(x2_ref, h0_ref, wx_ref, uzr_ref, u_ref, wout_ref, bout_ref,
                y_ref, hfin_ref, *, L, N, H):
    f32 = jnp.float32

    # ---- Hoist all weight loads out of the unrolled time loop (one vld each).
    wx = wx_ref[...]          # (I, 3H)
    uzr = uzr_ref[...]        # (H, 2H)  = [u_z | u_r]
    u = u_ref[...]            # (H, H)
    wout = wout_ref[...]      # (H, I)
    bout = bout_ref[...]      # (1, I)

    # ---- Phase 1: batched x-projections for ALL timesteps (one big matmul).
    # (L*N, I) @ (I, 3H) -> (L*N, 3H); columns are [z-gate | r-gate | candidate].
    xp = jnp.dot(x2_ref[...], wx, preferred_element_type=f32)

    # ---- Phase 2: sequential recurrence, h carried in vregs.
    # L is small and static -> fully unrolled (best LLO scheduling).  For long
    # sequences this becomes a lax.fori_loop over pl.ds windows + VMEM scratch.
    h = h0_ref[...].astype(f32)                               # (N, H)
    hs = []
    for t in range(L):
        xp_t = xp[t * N:(t + 1) * N, :]                       # (N, 3H), static slice
        # Fused u_z|u_r: a single MXU push on the recurrent critical path.
        hzr = jnp.dot(h, uzr, preferred_element_type=f32)     # (N, 2H)
        # Fused z|r sigmoid: one EUP stream instead of two.
        zr = jax.nn.sigmoid(xp_t[:, :2 * H] + hzr)            # (N, 2H)
        z = zr[:, :H]
        r = zr[:, H:]
        h_cand = jnp.tanh(
            jnp.dot(r * h, u, preferred_element_type=f32) + xp_t[:, 2 * H:])
        h = z * h + (1.0 - z) * h_cand                        # (N, H)
        hs.append(h)                                          # stays in vregs

    hfin_ref[...] = h.astype(hfin_ref.dtype)

    # ---- Phase 3: batched output Linear for ALL timesteps (one big matmul),
    # fed directly from the vreg-resident hidden history.
    h_all = jnp.concatenate(hs, axis=0)                       # (L*N, H)
    y = jnp.dot(h_all, wout, preferred_element_type=f32) + bout
    y_ref[...] = y.astype(y_ref.dtype)


def prepare_gru_params(params):
    """One-time parameter fusion (do NOT pay the concats on every forward)."""
    return {
        "wx": jnp.concatenate([params["w_z"], params["w_r"], params["w"]],
                              axis=1),                         # (I, 3H)
        "uzr": jnp.concatenate([params["u_z"], params["u_r"]], axis=1),  # (H, 2H)
        "u": params["u"],                                      # (H, H)
        "w_out_T": params["w_out_T"],                          # (H, I)
        "b_out": params["b_out"],                              # (1, I)
    }


def gru_forward(x, h0, fused):
    """x: (L, N, I) f32, h0: (N, H) f32, fused: output of prepare_gru_params."""
    L, N, I = x.shape
    H = h0.shape[-1]

    # Collapse (L, N) -> L*N so the x/output projections are single 2-D matmuls.
    x2 = x.reshape(L * N, I)

    vmem = pl.BlockSpec(memory_space=pltpu.MemorySpace.VMEM)

    y2, h_final = pl.pallas_call(
        functools.partial(_gru_kernel, L=L, N=N, H=H),
        out_shape=(
            jax.ShapeDtypeStruct((L * N, I), jnp.float32),
            jax.ShapeDtypeStruct((N, H), jnp.float32),
        ),
        in_specs=[vmem] * 7,
        out_specs=(vmem, vmem),
    )(x2, h0, fused["wx"], fused["uzr"], fused["u"], fused["w_out_T"],
      fused["b_out"])

    return y2.reshape(L, N, I), h_final


def _reference(x, h0, params):
    """Pure-JAX reference matching the PyTorch module semantics."""
    def step(h, xt):
        z = jax.nn.sigmoid(xt @ params["w_z"] + h @ params["u_z"])
        r = jax.nn.sigmoid(xt @ params["w_r"] + h @ params["u_r"])
        h_t = jnp.tanh((r * h) @ params["u"] + xt @ params["w"])
        h = z * h + (1 - z) * h_t
        y = h @ params["w_out_T"] + params["b_out"][0]
        return h, y
    h_final, ys = jax.lax.scan(step, h0, x)
    return ys, h_final


if __name__ == "__main__":
    L, N, I, H = 8, 8, 16, 32

    key = jax.random.PRNGKey(0)
    ks = jax.random.split(key, 10)
    params = {
        "w_z": jax.random.normal(ks[0], (I, H), jnp.float32),
        "u_z": jax.random.normal(ks[1], (H, H), jnp.float32),
        "w_r": jax.random.normal(ks[2], (I, H), jnp.float32),
        "u_r": jax.random.normal(ks[3], (H, H), jnp.float32),
        "u":   jax.random.normal(ks[4], (H, H), jnp.float32),
        "w":   jax.random.normal(ks[5], (I, H), jnp.float32),
        # nn.Linear(H, I): weight (I, H); store transposed (H, I) for h @ W^T
        "w_out_T": jax.random.normal(ks[6], (I, H), jnp.float32).T,
        "b_out":   jax.random.normal(ks[7], (1, I), jnp.float32),
    }

    x = jax.random.normal(ks[8], (L, N, I), jnp.float32)
    h0 = jnp.zeros((N, H), jnp.float32)   # PyTorch forward defaults h to zeros

    fused = jax.block_until_ready(prepare_gru_params(params))  # one-time fusion

    outputs, h_final = gru_forward(x, h0, fused)
    jax.block_until_ready((outputs, h_final))

    ref_out, ref_h = _reference(x, h0, params)
    assert jnp.allclose(outputs, ref_out, atol=1e-4, rtol=1e-4)
    assert jnp.allclose(h_final, ref_h, atol=1e-4, rtol=1e-4)

    print("KERNEL_OK")
</pallas_src>

<mosaic_0001>
module attributes {stable_mosaic.version = 11 : i64} {
  func.func @_gru_kernel(%arg0: memref<64x16xf32, #tpu.memory_space<vmem>>, %arg1: memref<8x32xf32, #tpu.memory_space<vmem>>, %arg2: memref<16x96xf32, #tpu.memory_space<vmem>>, %arg3: memref<32x64xf32, #tpu.memory_space<vmem>>, %arg4: memref<32x32xf32, #tpu.memory_space<vmem>>, %arg5: memref<32x16xf32, #tpu.memory_space<vmem>>, %arg6: memref<1x16xf32, #tpu.memory_space<vmem>>, %arg7: memref<64x16xf32, #tpu.memory_space<vmem>>, %arg8: memref<8x32xf32, #tpu.memory_space<vmem>>) attributes {dimension_semantics = [], scalar_prefetch = 0 : i64, scratch_operands = 0 : i64, tpu.core_type = #tpu.core_type<tc>} {
    %c0 = arith.constant 0 : index
    %c0_0 = arith.constant 0 : index
    %0 = vector.load %arg2[%c0, %c0_0] : memref<16x96xf32, #tpu.memory_space<vmem>>, vector<16x96xf32>
    %c0_1 = arith.constant 0 : index
    %c0_2 = arith.constant 0 : index
    %1 = vector.load %arg3[%c0_1, %c0_2] : memref<32x64xf32, #tpu.memory_space<vmem>>, vector<32x64xf32>
    %c0_3 = arith.constant 0 : index
    %c0_4 = arith.constant 0 : index
    %2 = vector.load %arg4[%c0_3, %c0_4] : memref<32x32xf32, #tpu.memory_space<vmem>>, vector<32x32xf32>
    %c0_5 = arith.constant 0 : index
    %c0_6 = arith.constant 0 : index
    %3 = vector.load %arg5[%c0_5, %c0_6] : memref<32x16xf32, #tpu.memory_space<vmem>>, vector<32x16xf32>
    %c0_7 = arith.constant 0 : index
    %c0_8 = arith.constant 0 : index
    %4 = vector.load %arg6[%c0_7, %c0_8] : memref<1x16xf32, #tpu.memory_space<vmem>>, vector<1x16xf32>
    %c0_9 = arith.constant 0 : index
    %c0_10 = arith.constant 0 : index
    %5 = vector.load %arg0[%c0_9, %c0_10] : memref<64x16xf32, #tpu.memory_space<vmem>>, vector<64x16xf32>
    %cst = arith.constant dense<0.000000e+00> : vector<64x96xf32>
    %6 = tpu.matmul %5, %0, %cst {dimension_numbers = #tpu.dot_dimension_numbers<[1], [0], [0], [1], [0, 0, 1, 1], [], []>} : vector<64x16xf32>, vector<16x96xf32>, vector<64x96xf32> -> vector<64x96xf32>
    %c0_11 = arith.constant 0 : index
    %c0_12 = arith.constant 0 : index
    %7 = vector.load %arg1[%c0_11, %c0_12] : memref<8x32xf32, #tpu.memory_space<vmem>>, vector<8x32xf32>
    %8 = vector.extract_strided_slice %6 {offsets = [0, 0], sizes = [8, 96], strides = [1, 1]} : vector<64x96xf32> to vector<8x96xf32>
    %cst_13 = arith.constant dense<0.000000e+00> : vector<8x64xf32>
    %9 = tpu.matmul %7, %1, %cst_13 {dimension_numbers = #tpu.dot_dimension_numbers<[1], [0], [0], [1], [0, 0, 1, 1], [], []>} : vector<8x32xf32>, vector<32x64xf32>, vector<8x64xf32> -> vector<8x64xf32>
    %10 = vector.extract_strided_slice %8 {offsets = [0, 0], sizes = [8, 64], strides = [1, 1]} : vector<8x96xf32> to vector<8x64xf32>
    %11 = arith.addf %10, %9 : vector<8x64xf32>
    %12 = arith.negf %11 : vector<8x64xf32>
    %13 = math.exp %12 : vector<8x64xf32>
    %cst_14 = arith.constant 1.000000e+00 : f32
    %14 = vector.broadcast %cst_14 : f32 to vector<8x64xf32>
    %15 = arith.addf %14, %13 : vector<8x64xf32>
    %16 = arith.divf %14, %15 : vector<8x64xf32>
    %17 = vector.extract_strided_slice %16 {offsets = [0, 0], sizes = [8, 32], strides = [1, 1]} : vector<8x64xf32> to vector<8x32xf32>
    %18 = vector.extract_strided_slice %16 {offsets = [0, 32], sizes = [8, 32], strides = [1, 1]} : vector<8x64xf32> to vector<8x32xf32>
    %19 = arith.mulf %18, %7 : vector<8x32xf32>
    %cst_15 = arith.constant dense<0.000000e+00> : vector<8x32xf32>
    %20 = tpu.matmul %19, %2, %cst_15 {dimension_numbers = #tpu.dot_dimension_numbers<[1], [0], [0], [1], [0, 0, 1, 1], [], []>} : vector<8x32xf32>, vector<32x32xf32>, vector<8x32xf32> -> vector<8x32xf32>
    %21 = vector.extract_strided_slice %8 {offsets = [0, 64], sizes = [8, 32], strides = [1, 1]} : vector<8x96xf32> to vector<8x32xf32>
    %22 = arith.addf %20, %21 : vector<8x32xf32>
    %23 = math.tanh %22 : vector<8x32xf32>
    %24 = arith.mulf %17, %7 : vector<8x32xf32>
    %cst_16 = arith.constant 1.000000e+00 : f32
    %25 = vector.broadcast %cst_16 : f32 to vector<8x32xf32>
    %26 = arith.subf %25, %17 : vector<8x32xf32>
    %27 = arith.mulf %26, %23 : vector<8x32xf32>
    %28 = arith.addf %24, %27 : vector<8x32xf32>
    %29 = vector.extract_strided_slice %6 {offsets = [8, 0], sizes = [8, 96], strides = [1, 1]} : vector<64x96xf32> to vector<8x96xf32>
    %cst_17 = arith.constant dense<0.000000e+00> : vector<8x64xf32>
    %30 = tpu.matmul %28, %1, %cst_17 {dimension_numbers = #tpu.dot_dimension_numbers<[1], [0], [0], [1], [0, 0, 1, 1], [], []>} : vector<8x32xf32>, vector<32x64xf32>, vector<8x64xf32> -> vector<8x64xf32>
    %31 = vector.extract_strided_slice %29 {offsets = [0, 0], sizes = [8, 64], strides = [1, 1]} : vector<8x96xf32> to vector<8x64xf32>
    %32 = arith.addf %31, %30 : vector<8x64xf32>
    %33 = arith.negf %32 : vector<8x64xf32>
    %34 = math.exp %33 : vector<8x64xf32>
    %cst_18 = arith.constant 1.000000e+00 : f32
    %35 = vector.broadcast %cst_18 : f32 to vector<8x64xf32>
    %36 = arith.addf %35, %34 : vector<8x64xf32>
    %37 = arith.divf %35, %36 : vector<8x64xf32>
    %38 = vector.extract_strided_slice %37 {offsets = [0, 0], sizes = [8, 32], strides = [1, 1]} : vector<8x64xf32> to vector<8x32xf32>
    %39 = vector.extract_strided_slice %37 {offsets = [0, 32], sizes = [8, 32], strides = [1, 1]} : vector<8x64xf32> to vector<8x32xf32>
    %40 = arith.mulf %39, %28 : vector<8x32xf32>
    %cst_19 = arith.constant dense<0.000000e+00> : vector<8x32xf32>
    %41 = tpu.matmul %40, %2, %cst_19 {dimension_numbers = #tpu.dot_dimension_numbers<[1], [0], [0], [1], [0, 0, 1, 1], [], []>} : vector<8x32xf32>, vector<32x32xf32>, vector<8x32xf32> -> vector<8x32xf32>
    %42 = vector.extract_strided_slice %29 {offsets = [0, 64], sizes = [8, 32], strides = [1, 1]} : vector<8x96xf32> to vector<8x32xf32>
    %43 = arith.addf %41, %42 : vector<8x32xf32>
    %44 = math.tanh %43 : vector<8x32xf32>
    %45 = arith.mulf %38, %28 : vector<8x32xf32>
    %cst_20 = arith.constant 1.000000e+00 : f32
    %46 = vector.broadcast %cst_20 : f32 to vector<8x32xf32>
    %47 = arith.subf %46, %38 : vector<8x32xf32>
    %48 = arith.mulf %47, %44 : vector<8x32xf32>
    %49 = arith.addf %45, %48 : vector<8x32xf32>
    %50 = vector.extract_strided_slice %6 {offsets = [16, 0], sizes = [8, 96], strides = [1, 1]} : vector<64x96xf32> to vector<8x96xf32>
    %cst_21 = arith.constant dense<0.000000e+00> : vector<8x64xf32>
    %51 = tpu.matmul %49, %1, %cst_21 {dimension_numbers = #tpu.dot_dimension_numbers<[1], [0], [0], [1], [0, 0, 1, 1], [], []>} : vector<8x32xf32>, vector<32x64xf32>, vector<8x64xf32> -> vector<8x64xf32>
    %52 = vector.extract_strided_slice %50 {offsets = [0, 0], sizes = [8, 64], strides = [1, 1]} : vector<8x96xf32> to vector<8x64xf32>
    %53 = arith.addf %52, %51 : vector<8x64xf32>
    %54 = arith.negf %53 : vector<8x64xf32>
    %55 = math.exp %54 : vector<8x64xf32>
    %cst_22 = arith.constant 1.000000e+00 : f32
    %56 = vector.broadcast %cst_22 : f32 to vector<8x64xf32>
    %57 = arith.addf %56, %55 : vector<8x64xf32>
    %58 = arith.divf %56, %57 : vector<8x64xf32>
    %59 = vector.extract_strided_slice %58 {offsets = [0, 0], sizes = [8, 32], strides = [1, 1]} : vector<8x64xf32> to vector<8x32xf32>
    %60 = vector.extract_strided_slice %58 {offsets = [0, 32], sizes = [8, 32], strides = [1, 1]} : vector<8x64xf32> to vector<8x32xf32>
    %61 = arith.mulf %60, %49 : vector<8x32xf32>
    %cst_23 = arith.constant dense<0.000000e+00> : vector<8x32xf32>
    %62 = tpu.matmul %61, %2, %cst_23 {dimension_numbers = #tpu.dot_dimension_numbers<[1], [0], [0], [1], [0, 0, 1, 1], [], []>} : vector<8x32xf32>, vector<32x32xf32>, vector<8x32xf32> -> vector<8x32xf32>
    %63 = vector.extract_strided_slice %50 {offsets = [0, 64], sizes = [8, 32], strides = [1, 1]} : vector<8x96xf32> to vector<8x32xf32>
    %64 = arith.addf %62, %63 : vector<8x32xf32>
    %65 = math.tanh %64 : vector<8x32xf32>
    %66 = arith.mulf %59, %49 : vector<8x32xf32>
    %cst_24 = arith.constant 1.000000e+00 : f32
    %67 = vector.broadcast %cst_24 : f32 to vector<8x32xf32>
    %68 = arith.subf %67, %59 : vector<8x32xf32>
    %69 = arith.mulf %68, %65 : vector<8x32xf32>
    %70 = arith.addf %66, %69 : vector<8x32xf32>
    %71 = vector.extract_strided_slice %6 {offsets = [24, 0], sizes = [8, 96], strides = [1, 1]} : vector<64x96xf32> to vector<8x96xf32>
    %cst_25 = arith.constant dense<0.000000e+00> : vector<8x64xf32>
    %72 = tpu.matmul %70, %1, %cst_25 {dimension_numbers = #tpu.dot_dimension_numbers<[1], [0], [0], [1], [0, 0, 1, 1], [], []>} : vector<8x32xf32>, vector<32x64xf32>, vector<8x64xf32> -> vector<8x64xf32>
    %73 = vector.extract_strided_slice %71 {offsets = [0, 0], sizes = [8, 64], strides = [1, 1]} : vector<8x96xf32> to vector<8x64xf32>
    %74 = arith.addf %73, %72 : vector<8x64xf32>
    %75 = arith.negf %74 : vector<8x64xf32>
    %76 = math.exp %75 : vector<8x64xf32>
    %cst_26 = arith.constant 1.000000e+00 : f32
    %77 = vector.broadcast %cst_26 : f32 to vector<8x64xf32>
    %78 = arith.addf %77, %76 : vector<8x64xf32>
    %79 = arith.divf %77, %78 : vector<8x64xf32>
    %80 = vector.extract_strided_slice %79 {offsets = [0, 0], sizes = [8, 32], strides = [1, 1]} : vector<8x64xf32> to vector<8x32xf32>
    %81 = vector.extract_strided_slice %79 {offsets = [0, 32], sizes = [8, 32], strides = [1, 1]} : vector<8x64xf32> to vector<8x32xf32>
    %82 = arith.mulf %81, %70 : vector<8x32xf32>
    %cst_27 = arith.constant dense<0.000000e+00> : vector<8x32xf32>
    %83 = tpu.matmul %82, %2, %cst_27 {dimension_numbers = #tpu.dot_dimension_numbers<[1], [0], [0], [1], [0, 0, 1, 1], [], []>} : vector<8x32xf32>, vector<32x32xf32>, vector<8x32xf32> -> vector<8x32xf32>
    %84 = vector.extract_strided_slice %71 {offsets = [0, 64], sizes = [8, 32], strides = [1, 1]} : vector<8x96xf32> to vector<8x32xf32>
    %85 = arith.addf %83, %84 : vector<8x32xf32>
    %86 = math.tanh %85 : vector<8x32xf32>
    %87 = arith.mulf %80, %70 : vector<8x32xf32>
    %cst_28 = arith.constant 1.000000e+00 : f32
    %88 = vector.broadcast %cst_28 : f32 to vector<8x32xf32>
    %89 = arith.subf %88, %80 : vector<8x32xf32>
    %90 = arith.mulf %89, %86 : vector<8x32xf32>
    %91 = arith.addf %87, %90 : vector<8x32xf32>
    %92 = vector.extract_strided_slice %6 {offsets = [32, 0], sizes = [8, 96], strides = [1, 1]} : vector<64x96xf32> to vector<8x96xf32>
    %cst_29 = arith.constant dense<0.000000e+00> : vector<8x64xf32>
    %93 = tpu.matmul %91, %1, %cst_29 {dimension_numbers = #tpu.dot_dimension_numbers<[1], [0], [0], [1], [0, 0, 1, 1], [], []>} : vector<8x32xf32>, vector<32x64xf32>, vector<8x64xf32> -> vector<8x64xf32>
    %94 = vector.extract_strided_slice %92 {offsets = [0, 0], sizes = [8, 64], strides = [1, 1]} : vector<8x96xf32> to vector<8x64xf32>
    %95 = arith.addf %94, %93 : vector<8x64xf32>
    %96 = arith.negf %95 : vector<8x64xf32>
    %97 = math.exp %96 : vector<8x64xf32>
    %cst_30 = arith.constant 1.000000e+00 : f32
    %98 = vector.broadcast %cst_30 : f32 to vector<8x64xf32>
    %99 = arith.addf %98, %97 : vector<8x64xf32>
    %100 = arith.divf %98, %99 : vector<8x64xf32>
    %101 = vector.extract_strided_slice %100 {offsets = [0, 0], sizes = [8, 32], strides = [1, 1]} : vector<8x64xf32> to vector<8x32xf32>
    %102 = vector.extract_strided_slice %100 {offsets = [0, 32], sizes = [8, 32], strides = [1, 1]} : vector<8x64xf32> to vector<8x32xf32>
    %103 = arith.mulf %102, %91 : vector<8x32xf32>
    %cst_31 = arith.constant dense<0.000000e+00> : vector<8x32xf32>
    %104 = tpu.matmul %103, %2, %cst_31 {dimension_numbers = #tpu.dot_dimension_numbers<[1], [0], [0], [1], [0, 0, 1, 1], [], []>} : vector<8x32xf32>, vector<32x32xf32>, vector<8x32xf32> -> vector<8x32xf32>
    %105 = vector.extract_strided_slice %92 {offsets = [0, 64], sizes = [8, 32], strides = [1, 1]} : vector<8x96xf32> to vector<8x32xf32>
    %106 = arith.addf %104, %105 : vector<8x32xf32>
    %107 = math.tanh %106 : vector<8x32xf32>
    %108 = arith.mulf %101, %91 : vector<8x32xf32>
    %cst_32 = arith.constant 1.000000e+00 : f32
    %109 = vector.broadcast %cst_32 : f32 to vector<8x32xf32>
    %110 = arith.subf %109, %101 : vector<8x32xf32>
    %111 = arith.mulf %110, %107 : vector<8x32xf32>
    %112 = arith.addf %108, %111 : vector<8x32xf32>
    %113 = vector.extract_strided_slice %6 {offsets = [40, 0], sizes = [8, 96], strides = [1, 1]} : vector<64x96xf32> to vector<8x96xf32>
    %cst_33 = arith.constant dense<0.000000e+00> : vector<8x64xf32>
    %114 = tpu.matmul %112, %1, %cst_33 {dimension_numbers = #tpu.dot_dimension_numbers<[1], [0], [0], [1], [0, 0, 1, 1], [], []>} : vector<8x32xf32>, vector<32x64xf32>, vector<8x64xf32> -> vector<8x64xf32>
    %115 = vector.extract_strided_slice %113 {offsets = [0, 0], sizes = [8, 64], strides = [1, 1]} : vector<8x96xf32> to vector<8x64xf32>
    %116 = arith.addf %115, %114 : vector<8x64xf32>
    %117 = arith.negf %116 : vector<8x64xf32>
    %118 = math.exp %117 : vector<8x64xf32>
    %cst_34 = arith.constant 1.000000e+00 : f32
    %119 = vector.broadcast %cst_34 : f32 to vector<8x64xf32>
    %120 = arith.addf %119, %118 : vector<8x64xf32>
    %121 = arith.divf %119, %120 : vector<8x64xf32>
    %122 = vector.extract_strided_slice %121 {offsets = [0, 0], sizes = [8, 32], strides = [1, 1]} : vector<8x64xf32> to vector<8x32xf32>
    %123 = vector.extract_strided_slice %121 {offsets = [0, 32], sizes = [8, 32], strides = [1, 1]} : vector<8x64xf32> to vector<8x32xf32>
    %124 = arith.mulf %123, %112 : vector<8x32xf32>
    %cst_35 = arith.constant dense<0.000000e+00> : vector<8x32xf32>
    %125 = tpu.matmul %124, %2, %cst_35 {dimension_numbers = #tpu.dot_dimension_numbers<[1], [0], [0], [1], [0, 0, 1, 1], [], []>} : vector<8x32xf32>, vector<32x32xf32>, vector<8x32xf32> -> vector<8x32xf32>
    %126 = vector.extract_strided_slice %113 {offsets = [0, 64], sizes = [8, 32], strides = [1, 1]} : vector<8x96xf32> to vector<8x32xf32>
    %127 = arith.addf %125, %126 : vector<8x32xf32>
    %128 = math.tanh %127 : vector<8x32xf32>
    %129 = arith.mulf %122, %112 : vector<8x32xf32>
    %cst_36 = arith.constant 1.000000e+00 : f32
    %130 = vector.broadcast %cst_36 : f32 to vector<8x32xf32>
    %131 = arith.subf %130, %122 : vector<8x32xf32>
    %132 = arith.mulf %131, %128 : vector<8x32xf32>
    %133 = arith.addf %129, %132 : vector<8x32xf32>
    %134 = vector.extract_strided_slice %6 {offsets = [48, 0], sizes = [8, 96], strides = [1, 1]} : vector<64x96xf32> to vector<8x96xf32>
    %cst_37 = arith.constant dense<0.000000e+00> : vector<8x64xf32>
    %135 = tpu.matmul %133, %1, %cst_37 {dimension_numbers = #tpu.dot_dimension_numbers<[1], [0], [0], [1], [0, 0, 1, 1], [], []>} : vector<8x32xf32>, vector<32x64xf32>, vector<8x64xf32> -> vector<8x64xf32>
    %136 = vector.extract_strided_slice %134 {offsets = [0, 0], sizes = [8, 64], strides = [1, 1]} : vector<8x96xf32> to vector<8x64xf32>
    %137 = arith.addf %136, %135 : vector<8x64xf32>
    %138 = arith.negf %137 : vector<8x64xf32>
    %139 = math.exp %138 : vector<8x64xf32>
    %cst_38 = arith.constant 1.000000e+00 : f32
    %140 = vector.broadcast %cst_38 : f32 to vector<8x64xf32>
    %141 = arith.addf %140, %139 : vector<8x64xf32>
    %142 = arith.divf %140, %141 : vector<8x64xf32>
    %143 = vector.extract_strided_slice %142 {offsets = [0, 0], sizes = [8, 32], strides = [1, 1]} : vector<8x64xf32> to vector<8x32xf32>
    %144 = vector.extract_strided_slice %142 {offsets = [0, 32], sizes = [8, 32], strides = [1, 1]} : vector<8x64xf32> to vector<8x32xf32>
    %145 = arith.mulf %144, %133 : vector<8x32xf32>
    %cst_39 = arith.constant dense<0.000000e+00> : vector<8x32xf32>
    %146 = tpu.matmul %145, %2, %cst_39 {dimension_numbers = #tpu.dot_dimension_numbers<[1], [0], [0], [1], [0, 0, 1, 1], [], []>} : vector<8x32xf32>, vector<32x32xf32>, vector<8x32xf32> -> vector<8x32xf32>
    %147 = vector.extract_strided_slice %134 {offsets = [0, 64], sizes = [8, 32], strides = [1, 1]} : vector<8x96xf32> to vector<8x32xf32>
    %148 = arith.addf %146, %147 : vector<8x32xf32>
    %149 = math.tanh %148 : vector<8x32xf32>
    %150 = arith.mulf %143, %133 : vector<8x32xf32>
    %cst_40 = arith.constant 1.000000e+00 : f32
    %151 = vector.broadcast %cst_40 : f32 to vector<8x32xf32>
    %152 = arith.subf %151, %143 : vector<8x32xf32>
    %153 = arith.mulf %152, %149 : vector<8x32xf32>
    %154 = arith.addf %150, %153 : vector<8x32xf32>
    %155 = vector.extract_strided_slice %6 {offsets = [56, 0], sizes = [8, 96], strides = [1, 1]} : vector<64x96xf32> to vector<8x96xf32>
    %cst_41 = arith.constant dense<0.000000e+00> : vector<8x64xf32>
    %156 = tpu.matmul %154, %1, %cst_41 {dimension_numbers = #tpu.dot_dimension_numbers<[1], [0], [0], [1], [0, 0, 1, 1], [], []>} : vector<8x32xf32>, vector<32x64xf32>, vector<8x64xf32> -> vector<8x64xf32>
    %157 = vector.extract_strided_slice %155 {offsets = [0, 0], sizes = [8, 64], strides = [1, 1]} : vector<8x96xf32> to vector<8x64xf32>
    %158 = arith.addf %157, %156 : vector<8x64xf32>
    %159 = arith.negf %158 : vector<8x64xf32>
    %160 = math.exp %159 : vector<8x64xf32>
    %cst_42 = arith.constant 1.000000e+00 : f32
    %161 = vector.broadcast %cst_42 : f32 to vector<8x64xf32>
    %162 = arith.addf %161, %160 : vector<8x64xf32>
    %163 = arith.divf %161, %162 : vector<8x64xf32>
    %164 = vector.extract_strided_slice %163 {offsets = [0, 0], sizes = [8, 32], strides = [1, 1]} : vector<8x64xf32> to vector<8x32xf32>
    %165 = vector.extract_strided_slice %163 {offsets = [0, 32], sizes = [8, 32], strides = [1, 1]} : vector<8x64xf32> to vector<8x32xf32>
    %166 = arith.mulf %165, %154 : vector<8x32xf32>
    %cst_43 = arith.constant dense<0.000000e+00> : vector<8x32xf32>
    %167 = tpu.matmul %166, %2, %cst_43 {dimension_numbers = #tpu.dot_dimension_numbers<[1], [0], [0], [1], [0, 0, 1, 1], [], []>} : vector<8x32xf32>, vector<32x32xf32>, vector<8x32xf32> -> vector<8x32xf32>
    %168 = vector.extract_strided_slice %155 {offsets = [0, 64], sizes = [8, 32], strides = [1, 1]} : vector<8x96xf32> to vector<8x32xf32>
    %169 = arith.addf %167, %168 : vector<8x32xf32>
    %170 = math.tanh %169 : vector<8x32xf32>
    %171 = arith.mulf %164, %154 : vector<8x32xf32>
    %cst_44 = arith.constant 1.000000e+00 : f32
    %172 = vector.broadcast %cst_44 : f32 to vector<8x32xf32>
    %173 = arith.subf %172, %164 : vector<8x32xf32>
    %174 = arith.mulf %173, %170 : vector<8x32xf32>
    %175 = arith.addf %171, %174 : vector<8x32xf32>
    %c0_45 = arith.constant 0 : index
    %c0_46 = arith.constant 0 : index
    %176 = vector.load %arg8[%c0_45, %c0_46] : memref<8x32xf32, #tpu.memory_space<vmem>>, vector<8x32xf32>
    tpu.vector_store %arg8[%c0_45, %c0_46], %175 {strides = array<i32>} : memref<8x32xf32, #tpu.memory_space<vmem>>, vector<8x32xf32>,
    %177 = tpu.concatenate %28, %49, %70, %91, %112, %133, %154, %175 in 0 : vector<8x32xf32>, vector<8x32xf32>, vector<8x32xf32>, vector<8x32xf32>, vector<8x32xf32>, vector<8x32xf32>, vector<8x32xf32>, vector<8x32xf32> -> vector<64x32xf32>
    %cst_47 = arith.constant dense<0.000000e+00> : vector<64x16xf32>
    %178 = tpu.matmul %177, %3, %cst_47 {dimension_numbers = #tpu.dot_dimension_numbers<[1], [0], [0], [1], [0, 0, 1, 1], [], []>} : vector<64x32xf32>, vector<32x16xf32>, vector<64x16xf32> -> vector<64x16xf32>
    %179 = vector.broadcast %4 : vector<1x16xf32> to vector<64x16xf32>
    %180 = arith.addf %178, %179 : vector<64x16xf32>
    %c0_48 = arith.constant 0 : index
    %c0_49 = arith.constant 0 : index
    %181 = vector.load %arg7[%c0_48, %c0_49] : memref<64x16xf32, #tpu.memory_space<vmem>>, vector<64x16xf32>
    tpu.vector_store %arg7[%c0_48, %c0_49], %180 {strides = array<i32>} : memref<64x16xf32, #tpu.memory_space<vmem>>, vector<64x16xf32>,
    return
  }
}

</mosaic_0001>

<bundles_post_ra>
// kernel: tpu_custom_call.1
= control target key start
LH: loop header
LB: loop body
LE: loop exit
PB: predicated region body
PF: predicated region fallthrough
CT: control target
= control target key end

     0   :  { %vm52_vm0 = vcmask 130048   ;;  %s2597_s0 = inlined_call_operand.vmem [shape: f32[64,16], index: 0, kind: input, shape index: {}]   ;;  %s2598_s1 = inlined_call_operand.vmem [shape: f32[8,32], index: 1, kind: input, shape index: {}]   ;;  %s2599_s2 = inlined_call_operand.vmem [shape: f32[16,96], index: 2, kind: input, shape index: {}]   ;;  %s2600_s3 = inlined_call_operand.vmem [shape: f32[32,64], index: 3, kind: input, shape index: {}]   ;;  %s2601_s4 = inlined_call_operand.vmem [shape: f32[32,32], index: 4, kind: input, shape index: {}]   ;;  %s2602_s5 = inlined_call_operand.vmem [shape: f32[32,16], index: 5, kind: input, shape index: {}]   ;;  %s2603_s6 = inlined_call_operand.vmem [shape: f32[1,16], index: 6, kind: input, shape index: {}]   ;;  %s2604_s7 = inlined_call_operand.vmem [shape: f32[64,16], index: 7, kind: output, shape index: {0}]   ;;  %s2605_s8 = inlined_call_operand.hbm [shape: f32[8,32], index: 8, kind: output, shape index: {1}]  }
   0x1   :  { %v29_v0 = vld [vmem:[%s2599_s2] sm:$0xff]  ;;  %v30_v1 = vld [vmem:[%s2599_s2 + $0x8] sm:$0xff]  ;;  %v50_v9 = vld [vmem:[%s2597_s0 + $0x30] sm:$0xff] }
   0x2   :  { %v48_v2 = vld [vmem:[%s2597_s0 + $0x20] sm:$0xff]  ;;  %v2024_v3 = vpack.c.bf16 %v30_v1, %v29_v0  ;;  %v32_v5 = vld [vmem:[%s2600_s3 + $0x8] sm:$0xff] }
   0x3   :  { %1822 = vmatprep.mubr.msk.f32.mxu1 %vm52_vm0, %v48_v2  ;;  %v31_v4 = vld [vmem:[%s2600_s3] sm:$0xff]  ;;  %v49_v6 = vld [vmem:[%s2597_s0 + $0x28] sm:$0xff] }
   0x4   :  { %2132 = vmatprep.subr.bf16.mxu1 %v2024_v3  ;;  %2025 = vmatprep.subr.bf16.mxu0 %v2024_v3  ;;  %v44_v7 = vld [vmem:[%s2597_s0] sm:$0xff]  ;;  %v2287_v8 = vpack.c.bf16 %v32_v5, %v31_v4  ;;  %v45_v10 = vld [vmem:[%s2597_s0 + $0x8] sm:$0xff] }
   0x5   :  { %2133 = vmatpush3.bf16.msra.mxu1 %v2024_v3  ;;  %2027 = vmatpush3.bf16.msra.mxu0 %v2024_v3 }
   0x6   :  { %14 = vsyncpa [#allocation3], 0  ;;  %v2213_v11 = vmov 0.0|0.0   ;;  %v33_v12 = vld [vmem:[%s2600_s3 + $0x10] sm:$0xff]  ;;  %v34_v13 = vld [vmem:[%s2600_s3 + $0x18] sm:$0xff]  ;;  %1816 = vmatprep.mubr.msk.f32.mxu0 %vm52_vm0, %v44_v7  ;;  %s2214_s28 = smov 32  }
   0x7   :  { %2028 = vmatprep.subr.bf16.mxu1 %v2213_v11  ;;  %v2306_v14 = vld [vmem:[%s2598_s1] sm:$0xff]  ;;  %2040 = vmatprep.subr.bf16.mxu0 %v2213_v11  ;;  %v51_v15 = vld [vmem:[%s2597_s0 + $0x38] sm:$0xff]  ;;  %v2318_v16 = vpack.c.bf16 %v34_v13, %v33_v12  ;;  %vm2215_vm1 = vmmov 0   ;;  %v2216_v17 = vmov 0.0   ;;  %vm183_vm2 = vcmask 261120   ;;  %v36_v19 = vld [vmem:[%s2601_s4 + $0x8] sm:$0xff] }
   0x8   :  { %264 = vrot.lane.b32.xlu0 %v2306_v14, %s2214_s28  ;;  %1823 = vmatmul.mubr.msk.f32.vlgmr.msra.gmra.mrb[0].mxu1 %vm52_vm0, %v49_v6  ;;  %v35_v18 = vld [vmem:[%s2601_s4] sm:$0xff]  ;;  %v37_v20 = vld [vmem:[%s2601_s4 + $0x10] sm:$0xff]  ;;  %v38_v22 = vld [vmem:[%s2601_s4 + $0x18] sm:$0xff]  ;;  %s2217_s15 = smov 64   ;;  %s2218_s4 = smov 96  }
   0x9   :  { %1817 = vmatmul.mubr.msk.f32.vlgmr.msra.gmra.mrb[0].mxu0 %vm52_vm0, %v45_v10  ;;  %2030 = vmatpush3.bf16.msra.mxu1 %v2287_v8  ;;  %v2343_v21 = vpack.c.bf16 %v36_v19, %v35_v18  ;;  %v2349_v23 = vpack.c.bf16 %v38_v22, %v37_v20  ;;  %v46_v40 = vld [vmem:[%s2597_s0 + $0x10] sm:$0xff]  ;;  %v47_v41 = vld [vmem:[%s2597_s0 + $0x18] sm:$0xff]  ;;  %s2219_s14 = smov [#allocation2]  }
   0xa   :  { %1825 = vmatprep.mubr.msk.f32.mxu1 %vm52_vm0, %v50_v9  ;;  %2031 = vmatprep.subr.bf16.mxu1 %v2213_v11 }
   0xb   :  { %2042 = vmatpush3.bf16.msra.mxu0 %v2287_v8  ;;  %1819 = vmatprep.mubr.msk.f32.mxu0 %vm52_vm0, %v46_v40 }
   0xc   :  { %2043 = vmatprep.subr.bf16.mxu0 %v2213_v11  ;;  %1826 = vmatmul.mubr.msk.f32.gmra.mrb[2].mxu1 %vm52_vm0, %v51_v15 }
   0xd   :  { %2033 = vmatpush3.bf16.msra.mxu1 %v2318_v16  ;;  %1836 = vmatprep.mubr.msk.f32.mxu1 %vm2215_vm1, %v2216_v17 }
   0xe   :  { %2034 = vmatprep.subr.bf16.mxu1 %v2213_v11  ;;  %1820 = vmatmul.mubr.msk.f32.gmra.mrb[2].mxu0 %vm52_vm0, %v47_v41 }
   0xf   :  { %2045 = vmatpush3.bf16.msra.mxu0 %v2318_v16  ;;  %1858 = vmatprep.mubr.msk.f32.mxu0 %vm2215_vm1, %v2216_v17 }
  0x10   :  { %2052 = vmatprep.subr.bf16.mxu0 %v2213_v11  ;;  %1837 = vmatmul.mubr.msk.f32.vlgmr.msra.gmra.mrb[4].mxu1 %vm183_vm2, %v2306_v14 }
  0x11   :  { %1847 = vmatprep.mubr.msk.f32.mxu1 %vm2215_vm1, %v2216_v17  ;;  %2036 = vmatpush3.bf16.msra.mxu1 %v2343_v21 }
  0x12   :  { %2037 = vmatprep.subr.bf16.mxu1 %v2213_v11 }
  0x15   :  { %2039 = vmatpush3.bf16.msra.mxu1 %v2349_v23 }
  0x16   :  { %2046 = vmatprep.subr.bf16.mxu1 %v2213_v11 }
  0x7a   :  { %v265_v36 = vpop.permute.xlu0 %264 }
  0xdb   :  { %v2354_v24 = vpop.f32.mrb[0].mxu1 }
  0xdc   :  { %v1818_v25 = vpop.f32.mrb[0].mxu0  ;;  %v2356_v26 = vpop.f32.mrb[1].mxu1 }
  0xdd   :  { %v143_v27 = vpop.f32.mrb[1].mxu0 }
  0xde   :  { %272 = vrot.lane.b32.xlu1 %v143_v27, %s2217_s15 }
  0xdf   :  { %v2359_v28 = vpop.f32.mrb[2].mxu1 }
  0xe0   :  { %v2361_v29 = vpop.f32.mrb[3].mxu1 }
  0xe1   :  { %v2395_v51 = vpop.f32.mrb[2].mxu0 }
  0xe2   :  { %v153_v52 = vpop.f32.mrb[3].mxu0 }
  0xe3   :  { %v253_v30 = vpop.f32.mrb[4].mxu1 }
  0xe4   :  { %v257_v31 = vadd.f32 %v253_v30, %v143_v27  ;;  %v1838_v32 = vpop.f32.mrb[5].mxu1 }
  0xe6   :  { %v1678_v33 = vmul.f32 -1.442695, %v257_v31 }
  0xe8   :  { %2141 = vpow2.f32 %v1678_v33 }
  0xf2   :  { %v2142_v34 = vpop.eup %2141 }
  0xf3   :  { %v261_v35 = vadd.f32 1.0, %v2142_v34 }
  0xf5   :  { %2143 = vrcp.f32 %v261_v35 }
  0xff   :  { %v2144_v37 = vpop.eup %2143 }
 0x100   :  { %v267_v38 = vmul.f32 %v2144_v37, %v265_v36  ;;  %v349_v46 = vsub.f32 1.0, %v2144_v37  ;;  %v348_v48 = vmul.f32 %v2144_v37, %v2306_v14 }
 0x102   :  { %269 = vrot.lane.b32.xlu0 %v267_v38, %s2218_s4 }
 0x150   :  { %v273_v42 = vpop.permute.xlu1 %272 }
 0x174   :  { %v270_v39 = vpop.permute.xlu0 %269 }
 0x175   :  { %1848 = vmatmul.mubr.msk.f32.vlgmr.msra.gmra.mrb[6].mxu1 %vm183_vm2, %v270_v39 }
 0x176   :  { %2048 = vmatpush3.bf16.msra.mxu1 %v2343_v21  ;;  %1869 = vmatprep.mubr.msk.f32.mxu1 %vm2215_vm1, %v2216_v17 }
 0x177   :  { %2049 = vmatprep.subr.bf16.mxu1 %v2213_v11 }
 0x17a   :  { %2051 = vmatpush3.bf16.msra.mxu1 %v2349_v23 }
 0x17b   :  { %2058 = vmatprep.subr.bf16.mxu1 %v2213_v11 }
 0x248   :  { %v343_v43 = vpop.f32.mrb[6].mxu1 }
 0x249   :  { %v344_v44 = vadd.f32 %v343_v43, %v273_v42  ;;  %v1849_v45 = vpop.f32.mrb[7].mxu1 }
 0x24b   :  { %2145 = vtanh.f32 %v344_v44 }
 0x255   :  { %v2146_v47 = vpop.eup %2145 }
 0x256   :  { %v350_v49 = vmul.f32 %v2146_v47, %v349_v46 }
 0x258   :  { %v2382_v50 = vadd.f32 %v350_v49, %v348_v48 }
 0x25a   :  { %432 = vrot.lane.b32.xlu1 %v2382_v50, %s2214_s28  ;;  %1859 = vmatmul.mubr.msk.f32.vlgmr.msra.gmra.mrb[4].mxu0 %vm183_vm2, %v2382_v50 }
 0x25b   :  { %2054 = vmatpush3.bf16.msra.mxu0 %v2287_v8  ;;  %1880 = vmatprep.mubr.msk.f32.mxu0 %vm2215_vm1, %v2216_v17 }
 0x25c   :  { %2055 = vmatprep.subr.bf16.mxu0 %v2213_v11 }
 0x25e   :  { %440 = vrot.lane.b32.xlu1 %v1818_v25, %s2217_s15 }
 0x25f   :  { %2057 = vmatpush3.bf16.msra.mxu0 %v2318_v16 }
 0x260   :  { %2064 = vmatprep.subr.bf16.mxu0 %v2213_v11 }
 0x2cc   :  { %v433_v60 = vpop.permute.xlu1 %432 }
 0x2d0   :  { %v441_v63 = vpop.permute.xlu1 %440 }
 0x32d   :  { %v421_v53 = vpop.f32.mrb[4].mxu0 }
 0x32e   :  { %v425_v54 = vadd.f32 %v1818_v25, %v421_v53  ;;  %v1860_v55 = vpop.f32.mrb[5].mxu0 }
 0x330   :  { %v1681_v56 = vmul.f32 -1.442695, %v425_v54 }
 0x332   :  { %2147 = vpow2.f32 %v1681_v56 }
 0x33c   :  { %v2148_v57 = vpop.eup %2147 }
 0x33d   :  { %v429_v58 = vadd.f32 1.0, %v2148_v57 }
 0x33f   :  { %2149 = vrcp.f32 %v429_v58 }
 0x349   :  { %v2150_v59 = vpop.eup %2149 }
 0x34a   :  { %v435_v61 = vmul.f32 %v2150_v59, %v433_v60  ;;  %v517_v3 = vsub.f32 1.0, %v2150_v59  ;;  %v516_v5 = vmul.f32 %v2150_v59, %v2382_v50 }
 0x34c   :  { %437 = vrot.lane.b32.xlu0 %v435_v61, %s2218_s4 }
 0x3be   :  { %v438_v62 = vpop.permute.xlu0 %437 }
 0x3bf   :  { %1870 = vmatmul.mubr.msk.f32.vlgmr.msra.gmra.mrb[8].mxu1 %vm183_vm2, %v438_v62 }
 0x3c0   :  { %2060 = vmatpush3.bf16.msra.mxu1 %v2343_v21  ;;  %1891 = vmatprep.mubr.msk.f32.mxu1 %vm2215_vm1, %v2216_v17 }
 0x3c1   :  { %2061 = vmatprep.subr.bf16.mxu1 %v2213_v11 }
 0x3c4   :  { %2063 = vmatpush3.bf16.msra.mxu1 %v2349_v23 }
 0x3c5   :  { %2070 = vmatprep.subr.bf16.mxu1 %v2213_v11 }
 0x492   :  { %v511_v0 = vpop.f32.mrb[8].mxu1 }
 0x493   :  { %v512_v1 = vadd.f32 %v511_v0, %v441_v63  ;;  %v1871_v2 = vpop.f32.mrb[9].mxu1 }
 0x495   :  { %2151 = vtanh.f32 %v512_v1 }
 0x49f   :  { %v2152_v4 = vpop.eup %2151 }
 0x4a0   :  { %v518_v6 = vmul.f32 %v2152_v4, %v517_v3 }
 0x4a2   :  { %v2406_v7 = vadd.f32 %v518_v6, %v516_v5 }
 0x4a4   :  { %600 = vrot.lane.b32.xlu0 %v2406_v7, %s2214_s28  ;;  %1881 = vmatmul.mubr.msk.f32.vlgmr.msra.gmra.mrb[6].mxu0 %vm183_vm2, %v2406_v7 }
 0x4a5   :  { %2066 = vmatpush3.bf16.msra.mxu0 %v2287_v8  ;;  %1902 = vmatprep.mubr.msk.f32.mxu0 %vm2215_vm1, %v2216_v17 }
 0x4a6   :  { %2067 = vmatprep.subr.bf16.mxu0 %v2213_v11 }
 0x4a8   :  { %608 = vrot.lane.b32.xlu0 %v153_v52, %s2217_s15 }
 0x4a9   :  { %2069 = vmatpush3.bf16.msra.mxu0 %v2318_v16 }
 0x4aa   :  { %2076 = vmatprep.subr.bf16.mxu0 %v2213_v11 }
 0x516   :  { %v601_v19 = vpop.permute.xlu0 %600 }
 0x51a   :  { %v609_v25 = vpop.permute.xlu0 %608 }
 0x577   :  { %v589_v9 = vpop.f32.mrb[6].mxu0 }
 0x578   :  { %v593_v10 = vadd.f32 %v589_v9, %v153_v52  ;;  %v1882_v12 = vpop.f32.mrb[7].mxu0 }
 0x57a   :  { %v1684_v13 = vmul.f32 -1.442695, %v593_v10 }
 0x57c   :  { %2153 = vpow2.f32 %v1684_v13 }
 0x586   :  { %v2154_v14 = vpop.eup %2153 }
 0x587   :  { %v597_v15 = vadd.f32 1.0, %v2154_v14 }
 0x589   :  { %2155 = vrcp.f32 %v597_v15 }
 0x593   :  { %v2156_v18 = vpop.eup %2155 }
 0x594   :  { %v603_v20 = vmul.f32 %v2156_v18, %v601_v19  ;;  %v685_v32 = vsub.f32 1.0, %v2156_v18  ;;  %v684_v34 = vmul.f32 %v2156_v18, %v2406_v7 }
 0x596   :  { %605 = vrot.lane.b32.xlu1 %v603_v20, %s2218_s4 }
 0x608   :  { %v606_v22 = vpop.permute.xlu1 %605 }
 0x609   :  { %1892 = vmatmul.mubr.msk.f32.vlgmr.msra.gmra.mrb[10].mxu1 %vm183_vm2, %v606_v22 }
 0x60a   :  { %2072 = vmatpush3.bf16.msra.mxu1 %v2343_v21  ;;  %1913 = vmatprep.mubr.msk.f32.mxu1 %vm2215_vm1, %v2216_v17 }
 0x60b   :  { %2073 = vmatprep.subr.bf16.mxu1 %v2213_v11 }
 0x60e   :  { %2075 = vmatpush3.bf16.msra.mxu1 %v2349_v23 }
 0x60f   :  { %2082 = vmatprep.subr.bf16.mxu1 %v2213_v11 }
 0x6dc   :  { %v679_v27 = vpop.f32.mrb[10].mxu1 }
 0x6dd   :  { %v680_v30 = vadd.f32 %v679_v27, %v609_v25  ;;  %v1893_v31 = vpop.f32.mrb[11].mxu1 }
 0x6df   :  { %2157 = vtanh.f32 %v680_v30 }
 0x6e9   :  { %v2158_v33 = vpop.eup %2157 }
 0x6ea   :  { %v686_v35 = vmul.f32 %v2158_v33, %v685_v32 }
 0x6ec   :  { %v2428_v36 = vadd.f32 %v686_v35, %v684_v34 }
 0x6ee   :  { %768 = vrot.lane.b32.xlu1 %v2428_v36, %s2214_s28  ;;  %1903 = vmatmul.mubr.msk.f32.vlgmr.msra.gmra.mrb[8].mxu0 %vm183_vm2, %v2428_v36 }
 0x6ef   :  { %2078 = vmatpush3.bf16.msra.mxu0 %v2287_v8  ;;  %1924 = vmatprep.mubr.msk.f32.mxu0 %vm2215_vm1, %v2216_v17 }
 0x6f0   :  { %2079 = vmatprep.subr.bf16.mxu0 %v2213_v11 }
 0x6f2   :  { %776 = vrot.lane.b32.xlu1 %v2395_v51, %s2217_s15 }
 0x6f3   :  { %2081 = vmatpush3.bf16.msra.mxu0 %v2318_v16 }
 0x6f4   :  { %2088 = vmatprep.subr.bf16.mxu0 %v2213_v11 }
 0x760   :  { %v769_v44 = vpop.permute.xlu1 %768 }
 0x764   :  { %v777_v47 = vpop.permute.xlu1 %776 }
 0x7c1   :  { %v757_v37 = vpop.f32.mrb[8].mxu0 }
 0x7c2   :  { %v761_v38 = vadd.f32 %v2395_v51, %v757_v37  ;;  %v1904_v39 = vpop.f32.mrb[9].mxu0 }
 0x7c4   :  { %v1687_v40 = vmul.f32 -1.442695, %v761_v38 }
 0x7c6   :  { %2159 = vpow2.f32 %v1687_v40 }
 0x7d0   :  { %v2160_v41 = vpop.eup %2159 }
 0x7d1   :  { %v765_v42 = vadd.f32 1.0, %v2160_v41 }
 0x7d3   :  { %2161 = vrcp.f32 %v765_v42 }
 0x7dd   :  { %v2162_v43 = vpop.eup %2161 }
 0x7de   :  { %v771_v45 = vmul.f32 %v2162_v43, %v769_v44  ;;  %v853_v52 = vsub.f32 1.0, %v2162_v43  ;;  %v852_v54 = vmul.f32 %v2162_v43, %v2428_v36 }
 0x7e0   :  { %773 = vrot.lane.b32.xlu0 %v771_v45, %s2218_s4 }
 0x852   :  { %v774_v46 = vpop.permute.xlu0 %773 }
 0x853   :  { %1914 = vmatmul.mubr.msk.f32.vlgmr.msra.gmra.mrb[12].mxu1 %vm183_vm2, %v774_v46 }
 0x854   :  { %2084 = vmatpush3.bf16.msra.mxu1 %v2343_v21  ;;  %1935 = vmatprep.mubr.msk.f32.mxu1 %vm2215_vm1, %v2216_v17 }
 0x855   :  { %2085 = vmatprep.subr.bf16.mxu1 %v2213_v11 }
 0x858   :  { %2087 = vmatpush3.bf16.msra.mxu1 %v2349_v23 }
 0x859   :  { %2094 = vmatprep.subr.bf16.mxu1 %v2213_v11 }
 0x926   :  { %v847_v48 = vpop.f32.mrb[12].mxu1 }
 0x927   :  { %v848_v49 = vadd.f32 %v847_v48, %v777_v47  ;;  %v1915_v51 = vpop.f32.mrb[13].mxu1 }
 0x929   :  { %2163 = vtanh.f32 %v848_v49 }
 0x933   :  { %v2164_v53 = vpop.eup %2163 }
 0x934   :  { %v854_v55 = vmul.f32 %v2164_v53, %v853_v52 }
 0x936   :  { %v2452_v56 = vadd.f32 %v854_v55, %v852_v54 }
 0x938   :  { %936 = vrot.lane.b32.xlu0 %v2452_v56, %s2214_s28  ;;  %1925 = vmatmul.mubr.msk.f32.vlgmr.msra.gmra.mrb[10].mxu0 %vm183_vm2, %v2452_v56 }
 0x939   :  { %2090 = vmatpush3.bf16.msra.mxu0 %v2287_v8  ;;  %1946 = vmatprep.mubr.msk.f32.mxu0 %vm2215_vm1, %v2216_v17 }
 0x93a   :  { %2091 = vmatprep.subr.bf16.mxu0 %v2213_v11 }
 0x93c   :  { %944 = vrot.lane.b32.xlu0 %v2356_v26, %s2217_s15 }
 0x93d   :  { %2093 = vmatpush3.bf16.msra.mxu0 %v2318_v16 }
 0x93e   :  { %2100 = vmatprep.subr.bf16.mxu0 %v2213_v11 }
 0x9aa   :  { %v937_v0 = vpop.permute.xlu0 %936 }
 0xa0b   :  { %v925_v57 = vpop.f32.mrb[10].mxu0 }
 0xa0c   :  { %v929_v58 = vadd.f32 %v925_v57, %v2356_v26  ;;  %v1926_v59 = vpop.f32.mrb[11].mxu0  ;;  %v945_v26 = vpop.permute.xlu0 %944 }
 0xa0e   :  { %v1690_v60 = vmul.f32 -1.442695, %v929_v58 }
 0xa10   :  { %2165 = vpow2.f32 %v1690_v60 }
 0xa1a   :  { %v2166_v61 = vpop.eup %2165 }
 0xa1b   :  { %v933_v62 = vadd.f32 1.0, %v2166_v61 }
 0xa1d   :  { %2167 = vrcp.f32 %v933_v62 }
 0xa27   :  { %v2168_v63 = vpop.eup %2167 }
 0xa28   :  { %v939_v1 = vmul.f32 %v2168_v63, %v937_v0  ;;  %v1021_v6 = vsub.f32 1.0, %v2168_v63  ;;  %v1020_v10 = vmul.f32 %v2168_v63, %v2452_v56 }
 0xa2a   :  { %941 = vrot.lane.b32.xlu1 %v939_v1, %s2218_s4 }
 0xa9c   :  { %v942_v2 = vpop.permute.xlu1 %941 }
 0xa9d   :  { %1936 = vmatmul.mubr.msk.f32.vlgmr.msra.gmra.mrb[14].mxu1 %vm183_vm2, %v942_v2 }
 0xa9e   :  { %2096 = vmatpush3.bf16.msra.mxu1 %v2343_v21  ;;  %1957 = vmatprep.mubr.msk.f32.mxu1 %vm2215_vm1, %v2216_v17 }
 0xa9f   :  { %2097 = vmatprep.subr.bf16.mxu1 %v2213_v11 }
 0xaa2   :  { %2099 = vmatpush3.bf16.msra.mxu1 %v2349_v23 }
 0xaa3   :  { %2106 = vmatprep.subr.bf16.mxu1 %v2213_v11 }
 0xb70   :  { %v1015_v3 = vpop.f32.mrb[14].mxu1 }
 0xb71   :  { %v1016_v4 = vadd.f32 %v1015_v3, %v945_v26  ;;  %v1937_v5 = vpop.f32.mrb[15].mxu1 }
 0xb73   :  { %2169 = vtanh.f32 %v1016_v4 }
 0xb7d   :  { %v2170_v9 = vpop.eup %2169 }
 0xb7e   :  { %v1022_v12 = vmul.f32 %v2170_v9, %v1021_v6 }
 0xb80   :  { %v2476_v13 = vadd.f32 %v1022_v12, %v1020_v10 }
 0xb82   :  { %1104 = vrot.lane.b32.xlu1 %v2476_v13, %s2214_s28  ;;  %1947 = vmatmul.mubr.msk.f32.vlgmr.msra.gmra.mrb[12].mxu0 %vm183_vm2, %v2476_v13 }
 0xb83   :  { %2102 = vmatpush3.bf16.msra.mxu0 %v2287_v8  ;;  %1968 = vmatprep.mubr.msk.f32.mxu0 %vm2215_vm1, %v2216_v17 }
 0xb84   :  { %2103 = vmatprep.subr.bf16.mxu0 %v2213_v11 }
 0xb86   :  { %1112 = vrot.lane.b32.xlu1 %v2354_v24, %s2217_s15 }
 0xb87   :  { %2105 = vmatpush3.bf16.msra.mxu0 %v2318_v16 }
 0xb88   :  { %2112 = vmatprep.subr.bf16.mxu0 %v2213_v11 }
 0xbf4   :  { %v1105_v27 = vpop.permute.xlu1 %1104 }
 0xc55   :  { %v1093_v14 = vpop.f32.mrb[12].mxu0 }
 0xc56   :  { %v1097_v15 = vadd.f32 %v2354_v24, %v1093_v14  ;;  %v1948_v18 = vpop.f32.mrb[13].mxu0  ;;  %v1113_v24 = vpop.permute.xlu1 %1112 }
 0xc58   :  { %v1693_v19 = vmul.f32 -1.442695, %v1097_v15 }
 0xc5a   :  { %2171 = vpow2.f32 %v1693_v19 }
 0xc64   :  { %v2172_v20 = vpop.eup %2171 }
 0xc65   :  { %v1101_v22 = vadd.f32 1.0, %v2172_v20 }
 0xc67   :  { %2173 = vrcp.f32 %v1101_v22 }
 0xc71   :  { %v2174_v25 = vpop.eup %2173 }
 0xc72   :  { %v1107_v30 = vmul.f32 %v2174_v25, %v1105_v27  ;;  %v1189_v35 = vsub.f32 1.0, %v2174_v25  ;;  %v1188_v38 = vmul.f32 %v2174_v25, %v2476_v13 }
 0xc74   :  { %1109 = vrot.lane.b32.xlu0 %v1107_v30, %s2218_s4 }
 0xce6   :  { %v1110_v31 = vpop.permute.xlu0 %1109 }
 0xce7   :  { %1958 = vmatmul.mubr.msk.f32.vlgmr.msra.gmra.mrb[16].mxu1 %vm183_vm2, %v1110_v31 }
 0xce8   :  { %2108 = vmatpush3.bf16.msra.mxu1 %v2343_v21  ;;  %1979 = vmatprep.mubr.msk.f32.mxu1 %vm2215_vm1, %v2216_v17 }
 0xce9   :  { %2109 = vmatprep.subr.bf16.mxu1 %v2213_v11 }
 0xcec   :  { %2111 = vmatpush3.bf16.msra.mxu1 %v2349_v23 }
 0xced   :  { %2118 = vmatprep.subr.bf16.mxu1 %v2213_v11 }
 0xdba   :  { %v1183_v32 = vpop.f32.mrb[16].mxu1 }
 0xdbb   :  { %v1184_v33 = vadd.f32 %v1183_v32, %v1113_v24  ;;  %v1959_v34 = vpop.f32.mrb[17].mxu1 }
 0xdbd   :  { %2175 = vtanh.f32 %v1184_v33 }
 0xdc7   :  { %v2176_v37 = vpop.eup %2175 }
 0xdc8   :  { %v1190_v39 = vmul.f32 %v2176_v37, %v1189_v35 }
 0xdca   :  { %v1191_v40 = vadd.f32 %v1190_v39, %v1188_v38 }
 0xdcc   :  { %1272 = vrot.lane.b32.xlu0 %v1191_v40, %s2214_s28  ;;  %1969 = vmatmul.mubr.msk.f32.vlgmr.msra.gmra.mrb[14].mxu0 %vm183_vm2, %v1191_v40 }
 0xdcd   :  { %2114 = vmatpush3.bf16.msra.mxu0 %v2287_v8  ;;  %1990 = vmatprep.mubr.msk.f32.mxu0 %vm2215_vm1, %v2216_v17 }
 0xdce   :  { %2115 = vmatprep.subr.bf16.mxu0 %v2213_v11 }
 0xdd0   :  { %1280 = vrot.lane.b32.xlu0 %v2361_v29, %s2217_s15 }
 0xdd1   :  { %2117 = vmatpush3.bf16.msra.mxu0 %v2318_v16  ;;  %v39_v16 = vld [vmem:[%s2602_s5] sm:$0xff] }
 0xe3e   :  { %v1273_v47 = vpop.permute.xlu0 %1272 }
 0xe42   :  { %v1281_v52 = vpop.permute.xlu0 %1280 }
 0xe9f   :  { %v1261_v41 = vpop.f32.mrb[14].mxu0 }
 0xea0   :  { %v1265_v42 = vadd.f32 %v1261_v41, %v2361_v29  ;;  %v1970_v43 = vpop.f32.mrb[15].mxu0  ;;  %v40_v29 = vld [vmem:[%s2602_s5 + $0x8] sm:$0xff] }
 0xea1   :  { %v2124_v51 = vpack.c.bf16 %v40_v29, %v39_v16 }
 0xea2   :  { %v1696_v44 = vmul.f32 -1.442695, %v1265_v42 }
 0xea3   :  { %2125 = vmatprep.subr.bf16.mxu0 %v2124_v51 }
 0xea4   :  { %2177 = vpow2.f32 %v1696_v44 }
 0xeae   :  { %v2178_v45 = vpop.eup %2177 }
 0xeaf   :  { %v1269_v46 = vadd.f32 1.0, %v2178_v45 }
 0xeb1   :  { %2179 = vrcp.f32 %v1269_v46 }
 0xebb   :  { %v2180_v8 = vpop.eup %2179 }
 0xebc   :  { %v1275_v48 = vmul.f32 %v2180_v8, %v1273_v47  ;;  %v1356_v57 = vmul.f32 %v2180_v8, %v1191_v40 }
 0xebe   :  { %1277 = vrot.lane.b32.xlu1 %v1275_v48, %s2218_s4 }
 0xf30   :  { %v1278_v49 = vpop.permute.xlu1 %1277 }
 0xf31   :  { %1980 = vmatmul.mubr.msk.f32.vlgmr.msra.gmra.mrb[18].mxu1 %vm183_vm2, %v1278_v49 }
 0xf32   :  { %2120 = vmatpush3.bf16.msra.mxu1 %v2343_v21  ;;  %2001 = vmatprep.mubr.msk.f32.mxu1 %vm2215_vm1, %v2216_v17  ;;  %v1357_v17 = vsub.f32 1.0, %v2180_v8 }
 0xf33   :  { %2121 = vmatprep.subr.bf16.mxu1 %v2213_v11  ;;  %v41_v11 = vld [vmem:[%s2602_s5 + $0x10] sm:$0xff] }
 0xf36   :  { %2123 = vmatpush3.bf16.msra.mxu1 %v2349_v23  ;;  %v42_v23 = vld [vmem:[%s2602_s5 + $0x18] sm:$0xff] }
 0xf37   :  { %v2128_v60 = vpack.c.bf16 %v42_v23, %v41_v11 }
0x1004   :  { %v1351_v53 = vpop.f32.mrb[18].mxu1 }
0x1005   :  { %v1352_v21 = vadd.f32 %v1351_v53, %v1281_v52  ;;  %v1981_v54 = vpop.f32.mrb[19].mxu1 }
0x1007   :  { %2181 = vtanh.f32 %v1352_v21 }
0x1011   :  { %v2182_v55 = vpop.eup %2181 }
0x1012   :  { %v1358_v58 = vmul.f32 %v2182_v55, %v1357_v17 }
0x1014   :  { %v1359_v59 = vadd.f32 %v1358_v58, %v1356_v57 }
0x1016   :  { %1440 = vrot.lane.b32.xlu1 %v1359_v59, %s2214_s28  ;;  %1991 = vmatmul.mubr.msk.f32.vlgmr.msra.gmra.mrb[16].mxu0 %vm183_vm2, %v1359_v59 }
0x1017   :  { %2127 = vmatpush3.bf16.msra.mxu0 %v2124_v51  ;;  %2012 = vmatprep.mubr.msk.f32.mxu0 %vm183_vm2, %v2382_v50 }
0x1018   :  { %2129 = vmatprep.subr.bf16.mxu0 %v2128_v60 }
0x101a   :  { %1448 = vrot.lane.b32.xlu1 %v2359_v28, %s2217_s15  ;;  %s1659_s15 = sshll.u32 %s2219_s14, 4  ;;  %s1660_s15 = int_to_ptr.vmem [resolvable:$true] %s1659_s15 }
0x101b   :  { %2131 = vmatpush3.bf16.msra.mxu0 %v2128_v60  ;;  %p2194_p1 = scmp.lt.s32.totalorder %s1660_s15, %s1660_s15 }
0x101e   :  { %2013 = vmatmul.mubr.msk.f32.vlgmr.msra.gmra.mrb[18].mxu0 %vm183_vm2, %v2406_v7  ;;  %v1701_v7 = vld [vmem:[%s2603_s6] ss:$0 sm:$0xff] }
0x101f   :  { %2015 = vmatprep.mubr.msk.f32.mxu0 %vm183_vm2, %v2428_v36 }
0x1022   :  { %2016 = vmatmul.mubr.msk.f32.gmra.mrb[20].mxu0 %vm183_vm2, %v2452_v56 }
0x1023   :  { %2018 = vmatprep.mubr.msk.f32.mxu0 %vm183_vm2, %v2476_v13 }
0x1026   :  { %2019 = vmatmul.mubr.msk.f32.gmra.mrb[22].mxu0 %vm183_vm2, %v1191_v40 }
0x1027   :  { %2021 = vmatprep.mubr.msk.f32.mxu0 %vm183_vm2, %v1359_v59 }
0x1088   :  { %v1441_v14 = vpop.permute.xlu1 %1440 }
0x108c   :  { %v1449_v19 = vpop.permute.xlu1 %1448 }
0x10e9   :  { %v1429_v50 = vpop.f32.mrb[16].mxu0 }
0x10ea   :  { %v1433_v61 = vadd.f32 %v2359_v28, %v1429_v50  ;;  %v1992_v62 = vpop.f32.mrb[17].mxu0 }
0x10ec   :  { %v1699_v63 = vmul.f32 -1.442695, %v1433_v61 }
0x10ee   :  { %2183 = vpow2.f32 %v1699_v63 }
0x10f1   :  { %v2014_v36 = vpop.f32.mrb[18].mxu0 }
0x10f2   :  { %v1610_v0 = vadd.f32 %v2014_v36, %v1701_v7  ;;  %v1604_v56 = vpop.f32.mrb[19].mxu0 }
0x10f3   :  { %v1605_v1 = vadd.f32 %v1701_v7, %v1604_v56 }
0x10f4   :  { %1644 = vst.msk [vmem:[%s2604_s7 + $0x8] sm:$0xff] %vm52_vm0, %v1610_v0 }
0x10f5   :  { %1643 = vst.msk [vmem:[%s2604_s7] sm:$0xff] %vm52_vm0, %v1605_v1  ;;  %v2017_v28 = vpop.f32.mrb[20].mxu0 }
0x10f6   :  { %v1620_v2 = vadd.f32 %v2017_v28, %v1701_v7  ;;  %v1614_v26 = vpop.f32.mrb[21].mxu0 }
0x10f7   :  { %v1615_v3 = vadd.f32 %v1701_v7, %v1614_v26 }
0x10f8   :  { %v2184_v4 = vpop.eup %2183  ;;  %1646 = vst.msk [vmem:[%s2604_s7 + $0x18] sm:$0xff] %vm52_vm0, %v1620_v2 }
0x10f9   :  { %v1437_v5 = vadd.f32 1.0, %v2184_v4  ;;  %1645 = vst.msk [vmem:[%s2604_s7 + $0x10] sm:$0xff] %vm52_vm0, %v1615_v3  ;;  %v2020_v6 = vpop.f32.mrb[22].mxu0 }
0x10fa   :  { %v1630_v9 = vadd.f32 %v2020_v6, %v1701_v7  ;;  %v1624_v10 = vpop.f32.mrb[23].mxu0 }
0x10fb   :  { %2185 = vrcp.f32 %v1437_v5  ;;  %v1625_v12 = vadd.f32 %v1701_v7, %v1624_v10 }
0x10fc   :  { %1648 = vst.msk [vmem:[%s2604_s7 + $0x28] sm:$0xff] %vm52_vm0, %v1630_v9 }
0x10fd   :  { %1647 = vst.msk [vmem:[%s2604_s7 + $0x20] sm:$0xff] %vm52_vm0, %v1625_v12 }
0x1105   :  { %v2186_v13 = vpop.eup %2185 }
0x1106   :  { %v1443_v15 = vmul.f32 %v2186_v13, %v1441_v14  ;;  %v1525_v27 = vsub.f32 1.0, %v2186_v13  ;;  %v1524_v31 = vmul.f32 %v2186_v13, %v1359_v59 }
0x1108   :  { %1445 = vrot.lane.b32.xlu0 %v1443_v15, %s2218_s4  ;;  %s2189_s4 = scalar_lea.vmem %s1660_s15, 128 }
0x1109   :  { %p2190_p0 = scmp.ne.s32.totalorder %s1660_s15, %s2189_s4  ;;  %p2195_p2 = scmp.lt.s32.totalorder %s2189_s4, %s2189_s4 }
0x110b   :  { %p2196_p3 = por %p2195_p2, %p2194_p1 }
0x110d   :  { %p2197_p4 = pnand %p2196_p3, %p2190_p0 }
0x117a   :  { %v1446_v18 = vpop.permute.xlu0 %1445 }
0x117b   :  { %2002 = vmatmul.mubr.msk.f32.vlgmr.msra.gmra.mrb[20].mxu1 %vm183_vm2, %v1446_v18 }
0x124e   :  { %v1519_v20 = vpop.f32.mrb[20].mxu1 }
0x124f   :  { %v1520_v22 = vadd.f32 %v1519_v20, %v1449_v19  ;;  %v2003_v25 = vpop.f32.mrb[21].mxu1 }
0x1251   :  { %2187 = vtanh.f32 %v1520_v22 }
0x125b   :  { %v2188_v30 = vpop.eup %2187 }
0x125c   :  { %v1526_v24 = vmul.f32 %v2188_v30, %v1525_v27 }
0x125e   :  { %v1527_v32 = vadd.f32 %v1526_v24, %v1524_v31 }
0x1260   :  { %2022 = vmatmul.mubr.msk.f32.gmra.mrb[24].mxu0 %vm183_vm2, %v1527_v32  ;;  %1528 = vst.msk [vmem:[#allocation2] sm:$0xff] %vm183_vm2, %v1527_v32 }
0x1261   :  { %2200 = shalt.err (!%p2197_p4)
}
0x1262   :  { %s2201_s17 = scalar_lea.hbm %s2605_s8, 128 }
0x1263   :  { %p2202_p5 = scmp.ne.s32.totalorder %s2605_s8, %s2201_s17  ;;  %p2205_p6 = scmp.lt.u32.totalorder %s2201_s17, %s2605_s8 }
0x1265   :  { %p2207_p7 = pnand %p2205_p6, %p2202_p5 }
0x1267   :  { %2210 = shalt.err (!%p2207_p7)
}
0x1268   :  { %1662 = dma.vmem_to_hbm [thread:$0]  %s1660_s15, 128, %s2605_s8, [#allocation3]  }
0x1333   :  { %v2023_v33 = vpop.f32.mrb[24].mxu0 }
0x1334   :  { %v1640_v34 = vadd.f32 %v2023_v33, %v1701_v7  ;;  %v1634_v35 = vpop.f32.mrb[25].mxu0 }
0x1335   :  { %v1635_v37 = vadd.f32 %v1701_v7, %v1634_v35 }
0x1336   :  { %1650 = vst.msk [vmem:[%s2604_s7 + $0x38] sm:$0xff] %vm52_vm0, %v1640_v34 }
0x1337   :  { %1649 = vst.msk [vmem:[%s2604_s7 + $0x30] sm:$0xff] %vm52_vm0, %v1635_v37 }
0x1338   :  { %2211 = dma.done.wait [#allocation3], 128  }
0x1339   :  { %2212 = vsyncadd [#allocation3], 4294967168 }
0x133a   :  { %1668 = vsyncpa [#allocation3], 1 }

</bundles_post_ra>
